<compile_context>
chip_gen: v7x
topology: tpu7x:2x2x1
jax: 0.10.0
libtpu: 0.0.40
codegen_flags: <defaults>
</compile_context>

<pallas_src>
import functools

import jax
import jax.numpy as jnp
from jax.experimental import pallas as pl
from jax.experimental.pallas import tpu as pltpu

LN_EPS = 1e-5


def _round_up(n: int, m: int) -> int:
    return ((n + m - 1) // m) * m


def _tpu_device_kind() -> str:
    try:
        return jax.devices()[0].device_kind.lower()
    except Exception:  # pragma: no cover - device query only, never the build
        return ""


def _projection_kernel(x_ref, w1_ref, w2_ref, ln_ref, o_ref, *, d_valid: int):
    # x_ref:  (tm, d_in)         input row tile (matmul dtype, e.g. bf16)
    # w1_ref: (d_in, d_out_p)    resident weight (matmul dtype)
    # w2_ref: (d_out_p, d_out_p) resident weight (matmul dtype)
    # ln_ref: (2, d_out_p)       f32 [gamma; beta], zero-padded past d_valid
    # o_ref:  (tm, d_out_p)      output tile (original activation dtype)

    # linear1 (no bias): native/bf16 operands on the MXU, f32 accumulation.
    embed1 = jnp.dot(x_ref[...], w1_ref[...],
                     preferred_element_type=jnp.float32)

    # quick-GELU in f32: x * sigmoid(1.702 x)   (sigmoid runs on the EUP).
    g = embed1 * jax.nn.sigmoid(1.702 * embed1)

    # linear2 (no bias); dropout is identity in eval mode.  The only extra VPU
    # op added for the fast path is this cast back to the matmul dtype.
    embed2 = jnp.dot(g.astype(w2_ref.dtype), w2_ref[...],
                     preferred_element_type=jnp.float32)

    y = embed1 + embed2  # f32; padded feature columns are exactly zero.

    # LayerNorm over the true d_valid features (padded columns masked out).
    d_pad = y.shape[-1]
    inv_d = 1.0 / float(d_valid)
    mean = jnp.sum(y, axis=-1, keepdims=True) * inv_d
    cent = y - mean
    if d_pad != d_valid:
        col = jax.lax.broadcasted_iota(jnp.int32, (1, d_pad), 1)
        cent = jnp.where(col < d_valid, cent, 0.0)
    var = jnp.sum(cent * cent, axis=-1, keepdims=True) * inv_d
    y_norm = cent * jax.lax.rsqrt(var + LN_EPS)
    out = y_norm * ln_ref[0:1, :] + ln_ref[1:2, :]

    o_ref[...] = out.astype(o_ref.dtype)


def projection_forward(x, w1, w2, gamma, beta, *, tm=None,
                       use_bf16_matmul: bool = True):
    """x: (..., d_in); w1: (d_in, d_out); w2: (d_out, d_out); gamma/beta: (d_out,)."""
    orig_shape = x.shape
    d_in = orig_shape[-1]
    x2 = x.reshape(-1, d_in)
    M = x2.shape[0]
    d_out = w1.shape[1]
    assert w1.shape == (d_in, d_out)
    assert w2.shape == (d_out, d_out)

    out_dtype = x.dtype

    # --- MXU operand dtype: bf16 is full-rate on v5e/v6e/v7x and halves
    #     weight residency; accumulation stays f32 inside the kernel. --------
    if use_bf16_matmul and x2.dtype in (jnp.float32, jnp.bfloat16):
        mm_dtype = jnp.bfloat16
    else:
        mm_dtype = x2.dtype
    x2 = x2.astype(mm_dtype)
    w1 = w1.astype(mm_dtype)
    w2 = w2.astype(mm_dtype)

    # --- lane-dense output: pad feature dim to a multiple of 128 ------------
    d_out_p = _round_up(d_out, 128)
    pad_f = d_out_p - d_out
    if pad_f:
        w1 = jnp.pad(w1, ((0, 0), (0, pad_f)))
        w2 = jnp.pad(w2, ((0, pad_f), (0, pad_f)))
        gamma = jnp.pad(gamma, (0, pad_f))
        beta = jnp.pad(beta, (0, pad_f))
    # Fused LayerNorm affine operand: row 0 = gamma, row 1 = beta (f32).
    ln_params = jnp.stack(
        [gamma.astype(jnp.float32), beta.astype(jnp.float32)], axis=0)

    # --- generation-aware tiling --------------------------------------------
    kind = _tpu_device_kind()
    is_v7 = "v7" in kind
    num_tc = 2 if is_v7 else 1                      # v7x: 2 TensorCores/chip
    vmem_cap = (64 << 20) if is_v7 else (128 << 20)

    if tm is None:
        # v6e has 128 MiB VMEM: a 512-row tile amortizes per-step overhead.
        tm = 512 if ("v6" in kind and M >= 512) else 256

    if num_tc > 1 and M > 128:
        # Split so both TensorCores get work; align tiles to the 128-wide MXU.
        tm_eff = min(tm, _round_up(-(-M // num_tc), 128))
    else:
        # Single-TC chips: the grid is a serial loop, use the biggest tile.
        tm_eff = min(tm, _round_up(M, 8))
    tm_eff = max(8, tm_eff)

    # --- VMEM budget (weights + double-buffered I/O tiles + f32 intermediates)
    w_isz = jnp.dtype(mm_dtype).itemsize
    x_isz = jnp.dtype(mm_dtype).itemsize
    o_isz = jnp.dtype(out_dtype).itemsize
    # Constant index_map -> weights DMA'd once, but charge the default 2 bufs.
    weight_bytes = 2 * (d_in * d_out_p + d_out_p * d_out_p) * w_isz
    ln_bytes = 2 * 2 * d_out_p * 4

    def _need(t):
        io_bytes = 2 * t * (d_in * x_isz + d_out_p * o_isz)   # dbl-buffered x/out
        interm_bytes = 4 * t * d_out_p * 4                    # embed1, g, embed2/y, cent
        return weight_bytes + ln_bytes + io_bytes + interm_bytes + (2 << 20)

    budget = vmem_cap - (4 << 20)
    while _need(tm_eff) > budget and tm_eff > 8:
        tm_eff = max(8, _round_up(tm_eff // 2, 8))
    # TODO(synk): if the resident weights alone exceed the budget (very large
    # d_out on v7x), add a K-tiling grid axis over d_in with an f32 accumulator.

    M_pad = _round_up(M, tm_eff)
    if M_pad != M:
        x2 = jnp.pad(x2, ((0, M_pad - M), (0, 0)))
    grid = (M_pad // tm_eff,)

    need = _need(tm_eff)
    vmem_limit = None if need <= (16 << 20) else int(min(need + (4 << 20),
                                                         vmem_cap))

    # --- advisory cost estimate for XLA's scheduler --------------------------
    cost = pl.CostEstimate(
        flops=2 * M_pad * d_in * d_out_p + 2 * M_pad * d_out_p * d_out_p,
        transcendentals=M_pad * d_out_p,
        bytes_accessed=(M_pad * d_in * x_isz
                        + (d_in * d_out_p + d_out_p * d_out_p) * w_isz
                        + 2 * d_out_p * 4
                        + M_pad * d_out_p * o_isz),
    )

    kernel = functools.partial(_projection_kernel, d_valid=d_out)

    grid_spec = pltpu.PrefetchScalarGridSpec(
        num_scalar_prefetch=0,
        grid=grid,
        in_specs=[
            pl.BlockSpec((tm_eff, d_in), lambda i: (i, 0)),        # x row tile
            pl.BlockSpec((d_in, d_out_p), lambda i: (0, 0)),       # W1^T (resident)
            pl.BlockSpec((d_out_p, d_out_p), lambda i: (0, 0)),    # W2^T (resident)
            pl.BlockSpec((2, d_out_p), lambda i: (0, 0)),          # [gamma; beta]
        ],
        out_specs=pl.BlockSpec((tm_eff, d_out_p), lambda i: (i, 0)),
    )

    out2 = pl.pallas_call(
        kernel,
        out_shape=jax.ShapeDtypeStruct((M_pad, d_out_p), out_dtype),
        grid_spec=grid_spec,
        compiler_params=pltpu.CompilerParams(
            dimension_semantics=("parallel",),
            vmem_limit_bytes=vmem_limit),
        cost_estimate=cost,
    )(x2, w1, w2, ln_params)

    out2 = out2[:M, :d_out]
    return out2.reshape(*orig_shape[:-1], d_out)


def projection_ref(x, w1, w2, gamma, beta):
    """Pure-JAX f32 reference (eval mode)."""
    x = x.astype(jnp.float32)
    e1 = x @ w1.astype(jnp.float32)
    g = e1 * jax.nn.sigmoid(1.702 * e1)
    e2 = g @ w2.astype(jnp.float32)
    y = e1 + e2
    mean = jnp.mean(y, axis=-1, keepdims=True)
    var = jnp.mean((y - mean) ** 2, axis=-1, keepdims=True)
    return (y - mean) / jnp.sqrt(var + LN_EPS) * gamma + beta


if __name__ == "__main__":
    # Small shapes consistent with the module: batch=2, seq=8, d_in=32, d_out=64.
    batch, seq, d_in, d_out = 2, 8, 32, 64

    key = jax.random.PRNGKey(0)
    kx, k1, k2 = jax.random.split(key, 3)

    x = jax.random.normal(kx, (batch, seq, d_in), dtype=jnp.float32)

    # nn.Linear weights are (d_out, d_in); pass the transpose to the kernel.
    w1_pt = jax.random.normal(k1, (d_out, d_in), dtype=jnp.float32) * (1.0 / d_in ** 0.5)
    w2_pt = jax.random.normal(k2, (d_out, d_out), dtype=jnp.float32) * (1.0 / d_out ** 0.5)
    w1 = w1_pt.T  # (d_in, d_out)
    w2 = w2_pt.T  # (d_out, d_out)

    # nn.LayerNorm default init: weight=1, bias=0.
    gamma = jnp.ones((d_out,), dtype=jnp.float32)
    beta = jnp.zeros((d_out,), dtype=jnp.float32)

    ref = projection_ref(x.reshape(batch * seq, d_in), w1, w2, gamma, beta)
    ref = ref.reshape(batch, seq, d_out)

    # Default fast path: bf16 MXU operands, f32 accumulation.
    out_fast = projection_forward(x, w1, w2, gamma, beta)
    jax.block_until_ready(out_fast)
    assert out_fast.shape == (batch, seq, d_out)
    assert jnp.allclose(out_fast.astype(jnp.float32), ref, atol=3e-2, rtol=3e-2), \
        "bf16-matmul path mismatch vs reference"

    # Opt-in exact-f32 path (tight tolerance).
    out_f32 = projection_forward(x, w1, w2, gamma, beta, use_bf16_matmul=False)
    jax.block_until_ready(out_f32)
    assert jnp.allclose(out_f32, ref, atol=1e-4, rtol=1e-4), \
        "f32 path mismatch vs reference"

    print("KERNEL_OK")
</pallas_src>

<mosaic_0001>
module attributes {stable_mosaic.version = 11 : i64} {
  func.func @_projection_kernel(%arg0: i32, %arg1: memref<16x32xbf16, #tpu.memory_space<vmem>>, %arg2: memref<32x128xbf16, #tpu.memory_space<vmem>>, %arg3: memref<128x128xbf16, #tpu.memory_space<vmem>>, %arg4: memref<2x128xf32, #tpu.memory_space<vmem>>, %arg5: memref<16x128xf32, #tpu.memory_space<vmem>>) attributes {dimension_semantics = [#tpu.dimension_semantics<parallel>], iteration_bounds = array<i64: 1>, scalar_prefetch = 0 : i64, scratch_operands = 0 : i64, tpu.core_type = #tpu.core_type<tc>, window_params = [{transform_indices = @transform_0, window_bounds = array<i64: 16, 32>}, {pipeline_mode = #tpu.pipeline_mode<synchronous>, transform_indices = @transform_1, window_bounds = array<i64: 32, 128>}, {pipeline_mode = #tpu.pipeline_mode<synchronous>, transform_indices = @transform_2, window_bounds = array<i64: 128, 128>}, {pipeline_mode = #tpu.pipeline_mode<synchronous>, transform_indices = @transform_3, window_bounds = array<i64: 2, 128>}, {transform_indices = @transform_4, window_bounds = array<i64: 16, 128>}]} {
    %c0 = arith.constant 0 : index
    %c0_0 = arith.constant 0 : index
    %0 = vector.load %arg1[%c0, %c0_0] : memref<16x32xbf16, #tpu.memory_space<vmem>>, vector<16x32xbf16>
    %c0_1 = arith.constant 0 : index
    %c0_2 = arith.constant 0 : index
    %1 = vector.load %arg2[%c0_1, %c0_2] : memref<32x128xbf16, #tpu.memory_space<vmem>>, vector<32x128xbf16>
    %cst = arith.constant dense<0.000000e+00> : vector<16x128xf32>
    %2 = tpu.matmul %0, %1, %cst {dimension_numbers = #tpu.dot_dimension_numbers<[1], [0], [0], [1], [0, 0, 1, 1], [], []>} : vector<16x32xbf16>, vector<32x128xbf16>, vector<16x128xf32> -> vector<16x128xf32>
    %cst_3 = arith.constant 1.702000e+00 : f32
    %3 = vector.broadcast %cst_3 : f32 to vector<16x128xf32>
    %4 = arith.mulf %3, %2 : vector<16x128xf32>
    %5 = arith.negf %4 : vector<16x128xf32>
    %6 = math.exp %5 : vector<16x128xf32>
    %cst_4 = arith.constant 1.000000e+00 : f32
    %7 = vector.broadcast %cst_4 : f32 to vector<16x128xf32>
    %8 = arith.addf %7, %6 : vector<16x128xf32>
    %9 = arith.divf %7, %8 : vector<16x128xf32>
    %10 = arith.mulf %2, %9 : vector<16x128xf32>
    %11 = arith.truncf %10 : vector<16x128xf32> to vector<16x128xbf16>
    %c0_5 = arith.constant 0 : index
    %c0_6 = arith.constant 0 : index
    %12 = vector.load %arg3[%c0_5, %c0_6] : memref<128x128xbf16, #tpu.memory_space<vmem>>, vector<128x128xbf16>
    %cst_7 = arith.constant dense<0.000000e+00> : vector<16x128xf32>
    %13 = tpu.matmul %11, %12, %cst_7 {dimension_numbers = #tpu.dot_dimension_numbers<[1], [0], [0], [1], [0, 0, 1, 1], [], []>} : vector<16x128xbf16>, vector<128x128xbf16>, vector<16x128xf32> -> vector<16x128xf32>
    %14 = arith.addf %2, %13 : vector<16x128xf32>
    %cst_8 = arith.constant dense<0.000000e+00> : vector<16xf32>
    %15 = vector.multi_reduction <add>, %14, %cst_8 [1] : vector<16x128xf32> to vector<16xf32>
    %16 = vector.shape_cast %15 : vector<16xf32> to vector<16x1xf32>
    %cst_9 = arith.constant 1.562500e-02 : f32
    %17 = vector.broadcast %cst_9 : f32 to vector<16x1xf32>
    %18 = arith.mulf %16, %17 : vector<16x1xf32>
    %19 = vector.broadcast %18 : vector<16x1xf32> to vector<16x128xf32>
    %20 = arith.subf %14, %19 : vector<16x128xf32>
    %21 = tpu.iota {dimensions = array<i32: 1>} : vector<1x128xi32>
    %c64_i32 = arith.constant 64 : i32
    %22 = vector.broadcast %c64_i32 : i32 to vector<1x128xi32>
    %23 = arith.cmpi slt, %21, %22 : vector<1x128xi32>
    %cst_10 = arith.constant 0.000000e+00 : f32
    %24 = vector.shape_cast %23 : vector<1x128xi1> to vector<1x128xi1>
    %25 = vector.broadcast %24 : vector<1x128xi1> to vector<16x128xi1>
    %26 = vector.broadcast %cst_10 : f32 to vector<16x128xf32>
    %27 = arith.select %25, %20, %26 : vector<16x128xi1>, vector<16x128xf32>
    %28 = arith.mulf %27, %27 : vector<16x128xf32>
    %cst_11 = arith.constant dense<0.000000e+00> : vector<16xf32>
    %29 = vector.multi_reduction <add>, %28, %cst_11 [1] : vector<16x128xf32> to vector<16xf32>
    %30 = vector.shape_cast %29 : vector<16xf32> to vector<16x1xf32>
    %cst_12 = arith.constant 1.562500e-02 : f32
    %31 = vector.broadcast %cst_12 : f32 to vector<16x1xf32>
    %32 = arith.mulf %30, %31 : vector<16x1xf32>
    %cst_13 = arith.constant 9.99999974E-6 : f32
    %33 = vector.broadcast %cst_13 : f32 to vector<16x1xf32>
    %34 = arith.addf %32, %33 : vector<16x1xf32>
    %35 = math.rsqrt %34 : vector<16x1xf32>
    %36 = vector.broadcast %35 : vector<16x1xf32> to vector<16x128xf32>
    %37 = arith.mulf %27, %36 : vector<16x128xf32>
    %c0_14 = arith.constant 0 : index
    %c0_15 = arith.constant 0 : index
    %38 = vector.load %arg4[%c0_14, %c0_15] : memref<2x128xf32, #tpu.memory_space<vmem>>, vector<1x128xf32>
    %39 = vector.broadcast %38 : vector<1x128xf32> to vector<16x128xf32>
    %40 = arith.mulf %37, %39 : vector<16x128xf32>
    %c1 = arith.constant 1 : index
    %c0_16 = arith.constant 0 : index
    %41 = vector.load %arg4[%c1, %c0_16] : memref<2x128xf32, #tpu.memory_space<vmem>>, vector<1x128xf32>
    %42 = vector.broadcast %41 : vector<1x128xf32> to vector<16x128xf32>
    %43 = arith.addf %40, %42 : vector<16x128xf32>
    %c0_17 = arith.constant 0 : index
    %c0_18 = arith.constant 0 : index
    %44 = vector.load %arg5[%c0_17, %c0_18] : memref<16x128xf32, #tpu.memory_space<vmem>>, vector<16x128xf32>
    tpu.vector_store %arg5[%c0_17, %c0_18], %43 {strides = array<i32>} : memref<16x128xf32, #tpu.memory_space<vmem>>, vector<16x128xf32>,
    return
  }
  func.func @transform_0(%arg0: i32) -> (i32, i32) {
    %c0_i32 = arith.constant 0 : i32
    %c0_i32_0 = arith.constant 0 : i32
    return %arg0, %c0_i32 : i32, i32
  }
  func.func @transform_1(%arg0: i32) -> (i32, i32) {
    %c0_i32 = arith.constant 0 : i32
    %c0_i32_0 = arith.constant 0 : i32
    %c0_i32_1 = arith.constant 0 : i32
    return %c0_i32, %c0_i32_0 : i32, i32
  }
  func.func @transform_2(%arg0: i32) -> (i32, i32) {
    %c0_i32 = arith.constant 0 : i32
    %c0_i32_0 = arith.constant 0 : i32
    %c0_i32_1 = arith.constant 0 : i32
    return %c0_i32, %c0_i32_0 : i32, i32
  }
  func.func @transform_3(%arg0: i32) -> (i32, i32) {
    %c0_i32 = arith.constant 0 : i32
    %c0_i32_0 = arith.constant 0 : i32
    %c0_i32_1 = arith.constant 0 : i32
    return %c0_i32, %c0_i32_0 : i32, i32
  }
  func.func @transform_4(%arg0: i32) -> (i32, i32) {
    %c0_i32 = arith.constant 0 : i32
    %c0_i32_0 = arith.constant 0 : i32
    return %arg0, %c0_i32 : i32, i32
  }
}

</mosaic_0001>

<bundles_post_ra>
// kernel: tpu_custom_call.1
= control target key start
LH: loop header
LB: loop body
LE: loop exit
PB: predicated region body
PF: predicated region fallthrough
CT: control target
= control target key end

     0   :  { %9 = vsyncpa [#allocation3], 0  ;;  %s603_s0 = inlined_call_operand.hbm [shape: bf16[16,32], index: 0, kind: input, shape index: {}]   ;;  %s604_s1 = inlined_call_operand.hbm [shape: bf16[32,128], index: 1, kind: input, shape index: {}]   ;;  %s605_s2 = inlined_call_operand.hbm [shape: bf16[128,128], index: 2, kind: input, shape index: {}]   ;;  %s606_s3 = inlined_call_operand.vmem [shape: f32[2,128], index: 3, kind: input, shape index: {}]   ;;  %s607_s4 = inlined_call_operand.hbm [shape: f32[16,128], index: 4, kind: output, shape index: {}]  }
   0x1   :  { %10 = vsyncpa [#allocation6], 0 }
   0x2   :  { %11 = vsyncpa [#allocation4], 0  ;;  %s498_s15 = smov [#allocation5]   ;;  %s499_s17 = smov [#allocation2]  }
   0x3   :  { %s29_s16 = sshll.u32 %s498_s15, 4  ;;  %s17_s18 = sshll.u32 %s499_s17, 4  ;;  %s30_s16 = int_to_ptr.vmem [resolvable:$true] %s29_s16  ;;  %s533_s18 = int_to_ptr.vmem [resolvable:$true] %s17_s18 }
   0x4   :  { %s404_s21 = scalar_lea.hbm %s604_s1, 256 }
   0x5   :  { %p405_p0 = scmp.ne.s32.totalorder %s604_s1, %s404_s21  ;;  %p408_p1 = scmp.lt.u32.totalorder %s404_s21, %s604_s1 }
   0x7   :  { %p410_p2 = pnand %p408_p1, %p405_p0 }
   0x9   :  { %413 = shalt.err (!%p410_p2)
}
   0xa   :  { %s414_s26 = scalar_lea.vmem %s30_s16, 256  ;;  %p419_p4 = scmp.lt.s32.totalorder %s30_s16, %s30_s16 }
   0xb   :  { %p415_p3 = scmp.ne.s32.totalorder %s30_s16, %s414_s26  ;;  %p420_p5 = scmp.lt.s32.totalorder %s414_s26, %s414_s26 }
   0xd   :  { %p421_p6 = por %p420_p5, %p419_p4 }
   0xf   :  { %p422_p7 = pnand %p421_p6, %p415_p3 }
  0x11   :  { %425 = shalt.err (!%p422_p7)
}
  0x12   :  { %s500_s27 = smov 64   ;;  %s501_s28 = smov 4  }
  0x13   :  { %35 = dma.hbm_to_vmem [thread:$0]  %s604_s1, 256, %s30_s16, [#allocation6], %s500_s27, %s500_s27, %s501_s28  }
  0x14   :  { %s426_s7 = scalar_lea.hbm %s603_s0, 128 }
  0x15   :  { %p427_p8 = scmp.ne.s32.totalorder %s603_s0, %s426_s7  ;;  %p430_p9 = scmp.lt.u32.totalorder %s426_s7, %s603_s0 }
  0x17   :  { %p432_p10 = pnand %p430_p9, %p427_p8 }
  0x19   :  { %435 = shalt.err (!%p432_p10)
}
  0x1a   :  { %s436_s12 = scalar_lea.vmem %s533_s18, 128  ;;  %p441_p12 = scmp.lt.s32.totalorder %s533_s18, %s533_s18 }
  0x1b   :  { %p437_p11 = scmp.ne.s32.totalorder %s533_s18, %s436_s12  ;;  %p442_p13 = scmp.lt.s32.totalorder %s436_s12, %s436_s12 }
  0x1d   :  { %p443_p0 = por %p442_p13, %p441_p12 }
  0x1f   :  { %p444_p1 = pnand %p443_p0, %p437_p11 }
  0x21   :  { %447 = shalt.err (!%p444_p1)
}
  0x22   :  { %23 = dma.hbm_to_vmem [thread:$0]  %s603_s0, 128, %s533_s18, [#allocation3], %s500_s27, %s500_s27, %s501_s28  }
  0x23   :  { %s502_s14 = smov [#allocation7]   ;;  %s448_s19 = scalar_lea.hbm %s605_s2, 1024 }
  0x24   :  { %s41_s15 = sshll.u32 %s502_s14, 4  ;;  %p449_p2 = scmp.ne.s32.totalorder %s605_s2, %s448_s19  ;;  %s42_s15 = int_to_ptr.vmem [resolvable:$true] %s41_s15 }
  0x25   :  { %p452_p3 = scmp.lt.u32.totalorder %s448_s19, %s605_s2 }
  0x27   :  { %p454_p4 = pnand %p452_p3, %p449_p2 }
  0x29   :  { %457 = shalt.err (!%p454_p4)
}
  0x2a   :  { %s458_s24 = scalar_lea.vmem %s42_s15, 1024  ;;  %p463_p6 = scmp.lt.s32.totalorder %s42_s15, %s42_s15 }
  0x2b   :  { %p459_p5 = scmp.ne.s32.totalorder %s42_s15, %s458_s24  ;;  %p464_p7 = scmp.lt.s32.totalorder %s458_s24, %s458_s24 }
  0x2d   :  { %p465_p8 = por %p464_p7, %p463_p6 }
  0x2f   :  { %p466_p9 = pnand %p465_p8, %p459_p5 }
  0x31   :  { %469 = shalt.err (!%p466_p9)
}
  0x32   :  { %47 = dma.hbm_to_vmem [thread:$0]  %s605_s2, 1024, %s42_s15, [#allocation6], %s500_s27, %s500_s27, %s501_s28  }
  0x33   :  { %492 = dma.done.wait [#allocation3], 128  }
  0x34   :  { %493 = vsyncadd [#allocation3], 4294967168 }
  0x35   :  { %494 = dma.done.wait [#allocation6], 1280  }
  0x36   :  { %495 = vsyncadd [#allocation6], 4294966016  ;;  %v503_v0 = vmov 0.0   ;;  %vm504_vm0 = vmmov 0   ;;  %v381_v1 = vld [vmem:[#allocation5] sm:$0xff]   ;;  %v382_v2 = vld [vmem:[#allocation5 + $0x8] sm:$0xff]   ;;  %v260_v35 = vlaneseq }
  0x37   :  { %343 = vmatprep.subr.bf16.mxu0 %v503_v0  ;;  %347 = vmatprep.mubr.msk.bf16.mxu0 %vm504_vm0, %v503_v0  ;;  %vm83_vm1 = vcmask 261120   ;;  %v383_v3 = vld [vmem:[#allocation2] sm:$0xff]   ;;  %v384_v4 = vld [vmem:[#allocation7] sm:$0xff]   ;;  %v386_v6 = vld [vmem:[#allocation7 + $0x10] sm:$0xff]   ;;  %s505_s28 = smov [#allocation8]  }
  0x38   :  { %351 = vmatprep.subr.bf16.mxu1 %v503_v0  ;;  %367 = vmatprep.mubr.msk.bf16.mxu1 %vm504_vm0, %v503_v0  ;;  %v385_v5 = vld [vmem:[#allocation7 + $0x8] sm:$0xff]   ;;  %v387_v7 = vld [vmem:[#allocation7 + $0x18] sm:$0xff]   ;;  %v388_v8 = vld [vmem:[#allocation7 + $0x20] sm:$0xff]   ;;  %v261_v36 = vand.u32 127, %v260_v35  ;;  %s302_s29 = sshll.u32 %s505_s28, 4  ;;  %s303_s29 = int_to_ptr.vmem [resolvable:$true] %s302_s29 }
  0x39   :  { %344 = vmatpush3.bf16.msra.mxu0 %v381_v1  ;;  %352 = vmatpush3.bf16.msra.mxu1 %v384_v4  ;;  %v389_v9 = vld [vmem:[#allocation7 + $0x28] sm:$0xff]   ;;  %v390_v10 = vld [vmem:[#allocation7 + $0x30] sm:$0xff]   ;;  %v391_v11 = vld [vmem:[#allocation7 + $0x38] sm:$0xff]   ;;  %s470_s30 = scalar_lea.vmem %s303_s29, 256  ;;  %p475_p11 = scmp.lt.s32.totalorder %s303_s29, %s303_s29 }
  0x3a   :  { %345 = vmatprep.subr.bf16.mxu0 %v503_v0  ;;  %353 = vmatprep.subr.bf16.mxu1 %v503_v0  ;;  %vm262_vm2 = vcmp.lt.s32.totalorder %v261_v36, 64  ;;  %v329_v54 = vld [vmem:[%s606_s3] ss:$0 sm:$0xff]  ;;  %v330_v56 = vld [vmem:[%s606_s3 + $0x1] ss:$0 sm:$0xff]  ;;  %p471_p10 = scmp.ne.s32.totalorder %s303_s29, %s470_s30  ;;  %p476_p12 = scmp.lt.s32.totalorder %s470_s30, %s470_s30 }
  0x3c   :  { %p477_p13 = por %p476_p12, %p475_p11 }
  0x3d   :  { %346 = vmatpush3.bf16.msra.mxu0 %v382_v2  ;;  %354 = vmatpush3.bf16.msra.mxu1 %v385_v5 }
  0x3e   :  { %355 = vmatprep.subr.bf16.mxu1 %v503_v0  ;;  %p478_p0 = pnand %p477_p13, %p471_p10 }
  0x40   :  { %348 = vmatmul.mubr.msk.bf16.vlgmr.msra.gmra.mrb[0].mxu0 %vm83_vm1, %v383_v3 }
  0x41   :  { %356 = vmatpush3.bf16.msra.mxu1 %v386_v6 }
  0x42   :  { %357 = vmatprep.subr.bf16.mxu1 %v503_v0 }
  0x45   :  { %358 = vmatpush3.bf16.msra.mxu1 %v387_v7 }
  0x46   :  { %359 = vmatprep.subr.bf16.mxu1 %v503_v0 }
  0x49   :  { %360 = vmatpush3.bf16.msra.mxu1 %v388_v8 }
  0x4a   :  { %361 = vmatprep.subr.bf16.mxu1 %v503_v0 }
  0x4d   :  { %362 = vmatpush3.bf16.msra.mxu1 %v389_v9 }
  0x4e   :  { %363 = vmatprep.subr.bf16.mxu1 %v503_v0 }
  0x51   :  { %364 = vmatpush3.bf16.msra.mxu1 %v390_v10 }
  0x52   :  { %365 = vmatprep.subr.bf16.mxu1 %v503_v0 }
  0x55   :  { %366 = vmatpush3.bf16.msra.mxu1 %v391_v11 }
 0x113   :  { %v121_v12 = vpop.f32.mrb[0].mxu0 }
 0x114   :  { %v319_v13 = vmul.f32 -1.702, %v121_v12  ;;  %v349_v14 = vpop.f32.mrb[1].mxu0 }
 0x115   :  { %v124_v15 = vpop.f32.mrb[2].mxu0 }
 0x116   :  { %v132_v16 = vmul.f32 1.442695, %v319_v13  ;;  %v320_v17 = vmul.f32 -1.702, %v124_v15  ;;  %v350_v18 = vpop.f32.mrb[3].mxu0 }
 0x118   :  { %392 = vpow2.f32 %v132_v16  ;;  %v134_v19 = vmul.f32 1.442695, %v320_v17 }
 0x11a   :  { %394 = vpow2.f32 %v134_v19 }
 0x122   :  { %v393_v20 = vpop.eup %392 }
 0x123   :  { %v136_v21 = vadd.f32 1.0, %v393_v20 }
 0x124   :  { %v395_v22 = vpop.eup %394 }
 0x125   :  { %396 = vrcp.f32 %v136_v21  ;;  %v137_v23 = vadd.f32 1.0, %v395_v22 }
 0x127   :  { %398 = vrcp.f32 %v137_v23 }
 0x12f   :  { %v397_v24 = vpop.eup %396 }
 0x130   :  { %v142_v26 = vmul.f32 %v397_v24, %v121_v12 }
 0x131   :  { %v399_v25 = vpop.eup %398 }
 0x132   :  { %v143_v27 = vmul.f32 %v399_v25, %v124_v15 }
 0x134   :  { %v144_v28 = vpack.c.bf16 %v143_v27, %v142_v26 }
 0x136   :  { %368 = vmatmul.mubr.bf16.vlgmr.msra.gmra.mrb[0].mxu1 %v144_v28 }
 0x209   :  { %v243_v29 = vpop.f32.mrb[0].mxu1 }
 0x20a   :  { %v250_v30 = vadd.f32 %v243_v29, %v121_v12  ;;  %v369_v31 = vpop.f32.mrb[1].mxu1 }
 0x20b   :  { %v246_v32 = vpop.f32.mrb[2].mxu1 }
 0x20c   :  { %v251_v33 = vadd.f32 %v246_v32, %v124_v15  ;;  %252 = vadd.xlane.f32.xlu0 %v250_v30  ;;  %v370_v34 = vpop.f32.mrb[3].mxu1 }
 0x210   :  { %254 = vadd.xlane.f32.xlu0 %v251_v33 }
 0x299   :  { %v253_v37 = vpop.xlane.xlu0 %252 }
 0x29a   :  { %v256_v38 = vmul.f32 0.015625, %v253_v37 }
 0x29c   :  { %v258_v39 = vsub.f32 %v250_v30, %v256_v38 }
 0x29d   :  { %v255_v40 = vpop.xlane.xlu0 %254 }
 0x29e   :  { %v257_v41 = vmul.f32 0.015625, %v255_v40  ;;  %v265_v42 = vsel %vm262_vm2, %v258_v39, 0.0 }
 0x29f   :  { %v267_v43 = vmul.f32 %v265_v42, %v265_v42 }
 0x2a0   :  { %v259_v44 = vsub.f32 %v251_v33, %v257_v41 }
 0x2a1   :  { %269 = vadd.xlane.f32.xlu1 %v267_v43 }
 0x2a2   :  { %v266_v45 = vsel %vm262_vm2, %v259_v44, 0.0 }
 0x2a3   :  { %v268_v46 = vmul.f32 %v266_v45, %v266_v45 }
 0x2a5   :  { %271 = vadd.xlane.f32.xlu1 %v268_v46 }
 0x32e   :  { %v270_v47 = vpop.xlane.xlu1 %269 }
 0x32f   :  { %v273_v48 = vmul.f32 0.015625, %v270_v47 }
 0x331   :  { %v275_v49 = vadd.f32 1e-05, %v273_v48 }
 0x332   :  { %v272_v50 = vpop.xlane.xlu1 %271 }
 0x333   :  { %400 = vrsqrt.f32 %v275_v49  ;;  %v274_v51 = vmul.f32 0.015625, %v272_v50 }
 0x335   :  { %v276_v52 = vadd.f32 1e-05, %v274_v51 }
 0x337   :  { %402 = vrsqrt.f32 %v276_v52 }
 0x33d   :  { %v401_v53 = vpop.eup %400 }
 0x33e   :  { %v279_v55 = vmul.f32 %v401_v53, %v265_v42 }
 0x340   :  { %v286_v57 = vmul.f32 %v329_v54, %v279_v55 }
 0x341   :  { %v403_v58 = vpop.eup %402 }
 0x342   :  { %v280_v59 = vmul.f32 %v403_v58, %v266_v45  ;;  %v293_v60 = vadd.f32 %v330_v56, %v286_v57 }
 0x344   :  { %v287_v61 = vmul.f32 %v329_v54, %v280_v59  ;;  %295 = vst [vmem:[#allocation8] sm:$0xff] %v293_v60 }
 0x346   :  { %v294_v62 = vadd.f32 %v330_v56, %v287_v61 }
 0x348   :  { %296 = vst [vmem:[#allocation8 + $0x8] sm:$0xff] %v294_v62 }
 0x349   :  { %481 = shalt.err (!%p478_p0)
}
 0x34a   :  { %s482_s6 = scalar_lea.hbm %s607_s4, 256 }
 0x34b   :  { %p483_p1 = scmp.ne.s32.totalorder %s607_s4, %s482_s6  ;;  %p486_p2 = scmp.lt.u32.totalorder %s482_s6, %s607_s4 }
 0x34d   :  { %p488_p3 = pnand %p486_p2, %p483_p1 }
 0x34f   :  { %491 = shalt.err (!%p488_p3)
}
 0x350   :  { %s506_s11 = smov 128   ;;  %s507_s12 = smov 8  }
 0x351   :  { %308 = dma.vmem_to_hbm [thread:$0]  %s303_s29, 256, %s607_s4, [#allocation4], %s506_s11, %s506_s11, %s507_s12  }
 0x352   :  { %496 = dma.done.wait [#allocation4], 256  }
 0x353   :  { %497 = vsyncadd [#allocation4], 4294967040 }
 0x354   :  { %312 = vsyncpa [#allocation3], 1 }
 0x355   :  { %313 = vsyncpa [#allocation6], 1 }
 0x356   :  { %314 = vsyncpa [#allocation4], 1 }

</bundles_post_ra>
